<compile_context>
chip_gen: v7x
topology: tpu7x:2x2x1
jax: 0.10.0
libtpu: 0.0.40
codegen_flags: <defaults>
</compile_context>

<pallas_src>
import functools
import inspect

import jax
import jax.numpy as jnp
import numpy as np
from jax.experimental import pallas as pl
from jax.experimental.pallas import tpu as pltpu

# TODO(synk): hrr.unit_projection convention assumed to be fft(x)/(|fft(x)|+eps);
# adjust EPS / normalization if the repo's hrr.py differs.
EPS = 1e-8
_HIGHEST = jax.lax.Precision.HIGHEST


def _supports_single_buffering():
    try:
        return (hasattr(pl, "Buffered")
                and "pipeline_mode" in inspect.signature(pl.BlockSpec).parameters)
    except Exception:
        return False


_SINGLE_BUF = _supports_single_buffering()


def _const_spec(shape):
    """BlockSpec for a grid-invariant operand: constant index_map and (when the
    installed Pallas supports it) a single pipeline buffer."""
    index_map = lambda b, t: (0,) * len(shape)
    if _SINGLE_BUF:
        return pl.BlockSpec(shape, index_map, pipeline_mode=pl.Buffered(1))
    return pl.BlockSpec(shape, index_map)


def _unit_projection(re, im):
    # 1/(sqrt(m)+eps) and rsqrt(m+eps^2) agree to O(eps); one EUP op instead of two.
    inv = jax.lax.rsqrt(re * re + im * im + EPS * EPS)
    return re * inv, im * inv


# --------------------------------------------------------------------------- #
# Kernels                                                                      #
# --------------------------------------------------------------------------- #
def _hrr_causal_kernel(x_ref, wkv_ref, bkv_ref, wq_ref, bq_ref,
                       idft_re_ref, idft_im_ref, o_ref,
                       carry_re_ref, carry_im_ref, tri_ref, *, dims, unit):
    D = dims
    t = pl.program_id(1)
    x = x_ref[0].astype(jnp.float32)                     # (T, D)
    T = x.shape[0]

    @pl.when(t == 0)
    def _():
        # Per-batch-row init (megacore-safe even if the batch axis is sharded).
        carry_re_ref[...] = jnp.zeros_like(carry_re_ref)
        carry_im_ref[...] = jnp.zeros_like(carry_im_ref)
        row = jax.lax.broadcasted_iota(jnp.int32, (T, T), 0)
        col = jax.lax.broadcasted_iota(jnp.int32, (T, T), 1)
        tri_ref[...] = jnp.where(row >= col, 1.0, 0.0).astype(tri_ref.dtype)

    # K/V spectra: Linear + per-head real DFT folded into wkv/bkv on the host.
    # Columns: [k_re | v_re | k_im | v_im].
    pkv = jnp.dot(x, wkv_ref[...], preferred_element_type=jnp.float32) + bkv_ref[...]
    kr, vr, ki, vi = (pkv[:, i * D:(i + 1) * D] for i in range(4))
    if unit:
        kr, ki = _unit_projection(kr, ki)
        vr, vi = _unit_projection(vr, vi)

    # bind(k, v): elementwise complex product of spectra.
    xr = kr * vr - ki * vi
    xi = kr * vi + ki * vr

    # Causal cumsum over seq: within-tile lower-triangular matmul + running carry.
    tri = tri_ref[...]
    sr = jnp.dot(tri, xr, preferred_element_type=jnp.float32) + carry_re_ref[...]
    si = jnp.dot(tri, xi, preferred_element_type=jnp.float32) + carry_im_ref[...]
    carry_re_ref[...] = sr[T - 1:T, :]
    carry_im_ref[...] = si[T - 1:T, :]

    # Q spectra just before unbind (fewer live (T, D) f32 intermediates).
    # Columns: [q_re | q_im].
    pq = jnp.dot(x, wq_ref[...], preferred_element_type=jnp.float32) + bq_ref[...]
    qr, qi = pq[:, :D], pq[:, D:]
    if unit:
        qr, qi = _unit_projection(qr, qi)

    # unbind(s, q): s * conj(q) in the frequency domain.
    yr = sr * qr + si * qi
    yi = si * qr - sr * qi

    # Per-head real iDFT (1/n + head block-diagonal folded in), straight to
    # (seq, dims) layout — no post-kernel transpose/reshape.
    o_ref[0] = (jnp.dot(yr, idft_re_ref[...], preferred_element_type=jnp.float32)
                + jnp.dot(yi, idft_im_ref[...], preferred_element_type=jnp.float32)
                ).astype(o_ref.dtype)


def _hrr_bind_sum_kernel(x_ref, wkv_ref, bkv_ref, sre_ref, sim_ref, *, dims, unit):
    """Non-causal pass 1: sum of bind(k, v) spectra over the whole sequence."""
    D = dims
    t = pl.program_id(1)

    @pl.when(t == 0)
    def _():
        sre_ref[...] = jnp.zeros_like(sre_ref)
        sim_ref[...] = jnp.zeros_like(sim_ref)

    x = x_ref[0].astype(jnp.float32)
    pkv = jnp.dot(x, wkv_ref[...], preferred_element_type=jnp.float32) + bkv_ref[...]
    kr, vr, ki, vi = (pkv[:, i * D:(i + 1) * D] for i in range(4))
    if unit:
        kr, ki = _unit_projection(kr, ki)
        vr, vi = _unit_projection(vr, vi)
    xr = kr * vr - ki * vi
    xi = kr * vi + ki * vr
    sre_ref[0] += jnp.sum(xr, axis=0, keepdims=True)
    sim_ref[0] += jnp.sum(xi, axis=0, keepdims=True)


def _hrr_broadcast_unbind_kernel(x_ref, wq_ref, bq_ref, sre_ref, sim_ref,
                                 idft_re_ref, idft_im_ref, o_ref, *, dims, unit):
    """Non-causal pass 2: unbind the broadcast total-sum spectrum against q."""
    D = dims
    x = x_ref[0].astype(jnp.float32)
    pq = jnp.dot(x, wq_ref[...], preferred_element_type=jnp.float32) + bq_ref[...]
    qr, qi = pq[:, :D], pq[:, D:]
    if unit:
        qr, qi = _unit_projection(qr, qi)
    sr = sre_ref[0]                                    # (1, D), broadcast over rows
    si = sim_ref[0]
    yr = sr * qr + si * qi
    yi = si * qr - sr * qi
    o_ref[0] = (jnp.dot(yr, idft_re_ref[...], preferred_element_type=jnp.float32)
                + jnp.dot(yi, idft_im_ref[...], preferred_element_type=jnp.float32)
                ).astype(o_ref.dtype)


# --------------------------------------------------------------------------- #
# Wrapper                                                                      #
# --------------------------------------------------------------------------- #
def _pick_seq_tile(seq, cap=256):
    """Largest multiple-of-8 divisor of seq that is <= cap (full seq if small)."""
    if seq <= cap:
        return seq
    best = 0
    for cand in range(8, cap + 1, 8):
        if seq % cand == 0:
            best = cand
    if best == 0:
        # TODO(synk): pad seq on the host instead of falling back to one big tile.
        return seq
    return best


def holographic_qkv(x, wq, bq, wk, bk, wv, bv, heads, *, causal=True, unit=True,
                    seq_tile=None, out_dtype=None):
    """x: (batch, seq, dims); w*: (dims, dims) torch-Linear weights (out, in); b*: (dims,)."""
    batch, seq, dims = x.shape
    hd = dims // heads
    assert heads * hd == dims, "dims must be divisible by heads"
    if out_dtype is None:
        out_dtype = x.dtype   # set to jnp.bfloat16 to halve HBM writeback if accepted

    # Real DFT matrices along head_dims (numpy, exact).
    idx = np.arange(hd)
    ang = 2.0 * np.pi * np.outer(idx, idx) / hd
    cos_np, sin_np = np.cos(ang), np.sin(ang)
    C = jnp.asarray(cos_np, jnp.float32)
    S = jnp.asarray(sin_np, jnp.float32)

    def fold_dft(w, b):
        # torch Linear y = x @ w.T + b, then per-head DFT along hd, folded into W/b.
        # Precision.HIGHEST: the folded weights feed a phase-sensitive normalization,
        # so the fold itself must not silently drop to bf16 on TPU.
        wt = jnp.transpose(w).astype(jnp.float32).reshape(dims, heads, hd)
        w_re = jnp.einsum('dhk,kf->dhf', wt, C, precision=_HIGHEST).reshape(dims, dims)
        w_im = -jnp.einsum('dhk,kf->dhf', wt, S, precision=_HIGHEST).reshape(dims, dims)
        bh = b.astype(jnp.float32).reshape(heads, hd)
        b_re = jnp.dot(bh, C, precision=_HIGHEST).reshape(dims)
        b_im = -jnp.dot(bh, S, precision=_HIGHEST).reshape(dims)
        return w_re, w_im, b_re, b_im

    wq_re, wq_im, bq_re, bq_im = fold_dft(wq, bq)
    wk_re, wk_im, bk_re, bk_im = fold_dft(wk, bk)
    wv_re, wv_im, bv_re, bv_im = fold_dft(wv, bv)

    # Fused K/V projection: columns [k_re | v_re | k_im | v_im]; Q: [q_re | q_im].
    w_kv = jnp.concatenate([wk_re, wv_re, wk_im, wv_im], axis=1)          # (D, 4D)
    b_kv = jnp.concatenate([bk_re, bv_re, bk_im, bv_im])[None, :]         # (1, 4D)
    w_q = jnp.concatenate([wq_re, wq_im], axis=1)                         # (D, 2D)
    b_q = jnp.concatenate([bq_re, bq_im])[None, :]                        # (1, 2D)

    # Real iDFT with 1/hd folded in, block-diagonal over heads, split re/im halves.
    eye = np.eye(heads, dtype=np.float32)
    idft_re = jnp.asarray(np.kron(eye, cos_np / hd), jnp.float32)         # (D, D)
    idft_im = jnp.asarray(np.kron(eye, -sin_np / hd), jnp.float32)        # (D, D)

    if seq_tile is None:
        seq_tile = _pick_seq_tile(seq)
    assert seq % seq_tile == 0
    assert seq_tile == seq or seq_tile % 8 == 0, "seq_tile must be a multiple of 8"
    num_tiles = seq // seq_tile

    # Explicit VMEM budget: single-buffered resident weights + double-buffered x/out
    # tiles + mask/carry scratch + headroom for the live (T, D) f32 intermediates.
    f32 = 4
    resident = (w_kv.size + w_q.size + idft_re.size + idft_im.size
                + b_kv.size + b_q.size) * f32
    tiles = 2 * seq_tile * dims * (x.dtype.itemsize + jnp.dtype(out_dtype).itemsize)
    scratch = (seq_tile * seq_tile + 2 * dims) * f32
    intermediates = 16 * seq_tile * dims * f32
    vmem_limit = int(min(128 * 2 ** 20,
                         max(32 * 2 ** 20,
                             1.4 * (resident + tiles + scratch + intermediates))))

    x_spec = pl.BlockSpec((1, seq_tile, dims), lambda b, t: (b, t, 0))
    out_spec = pl.BlockSpec((1, seq_tile, dims), lambda b, t: (b, t, 0))
    wkv_spec = _const_spec((dims, 4 * dims))
    bkv_spec = _const_spec((1, 4 * dims))
    wq_spec = _const_spec((dims, 2 * dims))
    bq_spec = _const_spec((1, 2 * dims))
    idft_spec = _const_spec((dims, dims))

    if causal:
        kernel = functools.partial(_hrr_causal_kernel, dims=dims, unit=unit)
        return pl.pallas_call(
            kernel,
            out_shape=jax.ShapeDtypeStruct((batch, seq, dims), out_dtype),
            grid_spec=pltpu.PrefetchScalarGridSpec(
                num_scalar_prefetch=0,
                grid=(batch, num_tiles),
                in_specs=[x_spec, wkv_spec, bkv_spec, wq_spec, bq_spec,
                          idft_spec, idft_spec],
                out_specs=out_spec,
                scratch_shapes=[pltpu.VMEM((1, dims), jnp.float32),      # carry re
                                pltpu.VMEM((1, dims), jnp.float32),      # carry im
                                pltpu.VMEM((seq_tile, seq_tile), jnp.float32)]),
            compiler_params=pltpu.CompilerParams(
                dimension_semantics=("parallel", "arbitrary"),
                vmem_limit_bytes=vmem_limit),
        )(x, w_kv, b_kv, w_q, b_q, idft_re, idft_im)

    # Non-causal: tiled two-pass — (1) bind(k,v) spectra summed over seq, (2)
    # broadcast-unbind against q per tile.  No (seq, seq) matrices anywhere.
    sum_spec = pl.BlockSpec((1, 1, dims), lambda b, t: (b, 0, 0))
    s_re, s_im = pl.pallas_call(
        functools.partial(_hrr_bind_sum_kernel, dims=dims, unit=unit),
        out_shape=(jax.ShapeDtypeStruct((batch, 1, dims), jnp.float32),
                   jax.ShapeDtypeStruct((batch, 1, dims), jnp.float32)),
        grid_spec=pltpu.PrefetchScalarGridSpec(
            num_scalar_prefetch=0,
            grid=(batch, num_tiles),
            in_specs=[x_spec, wkv_spec, bkv_spec],
            out_specs=[sum_spec, sum_spec]),
        compiler_params=pltpu.CompilerParams(
            dimension_semantics=("parallel", "arbitrary"),
            vmem_limit_bytes=vmem_limit),
    )(x, w_kv, b_kv)

    return pl.pallas_call(
        functools.partial(_hrr_broadcast_unbind_kernel, dims=dims, unit=unit),
        out_shape=jax.ShapeDtypeStruct((batch, seq, dims), out_dtype),
        grid_spec=pltpu.PrefetchScalarGridSpec(
            num_scalar_prefetch=0,
            grid=(batch, num_tiles),
            in_specs=[x_spec, wq_spec, bq_spec, sum_spec, sum_spec,
                      idft_spec, idft_spec],
            out_specs=out_spec),
        compiler_params=pltpu.CompilerParams(
            dimension_semantics=("parallel", "parallel"),
            vmem_limit_bytes=vmem_limit),
    )(x, w_q, b_q, s_re, s_im, idft_re, idft_im)


# --------------------------------------------------------------------------- #
# Pure-JAX reference + test                                                    #
# --------------------------------------------------------------------------- #
def ref_forward(x, wq, bq, wk, bk, wv, bv, heads, *, causal=True, unit=True):
    """Pure-JAX reference with jnp.fft (mirrors the PyTorch forward)."""
    b, s_, d = x.shape
    hd = d // heads
    proj = lambda a, w, bias: jnp.dot(a, w.T, precision=_HIGHEST) + bias
    q = proj(x, wq, bq)
    k = proj(x, wk, bk)
    v = proj(x, wv, bv)
    q, k, v = (t.reshape(b, s_, heads, hd) for t in (q, k, v))

    fft = lambda a: jnp.fft.fft(a, axis=-1)
    ifft = lambda a: jnp.fft.ifft(a, axis=-1)

    def unit_projection(a):
        f = fft(a)
        return jnp.real(ifft(f / (jnp.abs(f) + EPS)))

    if unit:
        q, k, v = map(unit_projection, (q, k, v))
    xk = jnp.real(ifft(fft(k) * fft(v)))
    if causal:
        s = jnp.cumsum(xk, axis=1)
    else:
        s = jnp.sum(xk, axis=1, keepdims=True)
    vals = jnp.real(ifft(fft(s) * jnp.conj(fft(q))))
    vals = jnp.broadcast_to(vals, (b, s_, heads, hd))
    return vals.reshape(b, s_, d)


def xavier_uniform(key, shape):
    fan_out, fan_in = shape
    bound = float(np.sqrt(6.0 / (fan_in + fan_out)))
    return jax.random.uniform(key, shape, jnp.float32, -bound, bound)


if __name__ == "__main__":
    batch, seq, heads, dims = 2, 8, 4, 32

    key = jax.random.PRNGKey(0)
    kx, kx2, kq, kk, kv = jax.random.split(key, 5)
    x = jax.random.normal(kx, (batch, seq, dims), jnp.float32)

    # nn.Linear(dims, dims): weight (out, in) xavier-uniform (gain=1), bias zeros.
    wq = xavier_uniform(kq, (dims, dims))
    wk = xavier_uniform(kk, (dims, dims))
    wv = xavier_uniform(kv, (dims, dims))
    bq = jnp.zeros((dims,), jnp.float32)
    bk = jnp.zeros((dims,), jnp.float32)
    bv = jnp.zeros((dims,), jnp.float32)

    # 1) causal, single seq tile (the module's default configuration).
    out = holographic_qkv(x, wq, bq, wk, bk, wv, bv, heads, causal=True, unit=True)
    out = jax.block_until_ready(out)
    ref = ref_forward(x, wq, bq, wk, bk, wv, bv, heads, causal=True, unit=True)
    np.testing.assert_allclose(np.asarray(out), np.asarray(ref), atol=2e-2, rtol=2e-2)

    # 2) causal, multiple seq tiles (exercises the running-carry cumsum).
    x2 = jax.random.normal(kx2, (batch, 4 * seq, dims), jnp.float32)
    out2 = holographic_qkv(x2, wq, bq, wk, bk, wv, bv, heads, causal=True, unit=True,
                           seq_tile=8)
    out2 = jax.block_until_ready(out2)
    ref2 = ref_forward(x2, wq, bq, wk, bk, wv, bv, heads, causal=True, unit=True)
    np.testing.assert_allclose(np.asarray(out2), np.asarray(ref2), atol=2e-2, rtol=2e-2)

    # 3) non-causal (tiled two-pass sum + broadcast-unbind).
    out3 = holographic_qkv(x2, wq, bq, wk, bk, wv, bv, heads, causal=False, unit=True,
                           seq_tile=8)
    out3 = jax.block_until_ready(out3)
    ref3 = ref_forward(x2, wq, bq, wk, bk, wv, bv, heads, causal=False, unit=True)
    np.testing.assert_allclose(np.asarray(out3), np.asarray(ref3), atol=2e-2, rtol=2e-2)

    print("KERNEL_OK")
</pallas_src>

<mosaic_0001>
module attributes {stable_mosaic.version = 11 : i64} {
  func.func @_hrr_causal_kernel(%arg0: i32, %arg1: i32, %arg2: memref<1x8x32xf32, #tpu.memory_space<vmem>>, %arg3: memref<32x128xf32, #tpu.memory_space<vmem>>, %arg4: memref<1x128xf32, #tpu.memory_space<vmem>>, %arg5: memref<32x64xf32, #tpu.memory_space<vmem>>, %arg6: memref<1x64xf32, #tpu.memory_space<vmem>>, %arg7: memref<32x32xf32, #tpu.memory_space<vmem>>, %arg8: memref<32x32xf32, #tpu.memory_space<vmem>>, %arg9: memref<1x8x32xf32, #tpu.memory_space<vmem>>, %arg10: memref<1x32xf32, #tpu.memory_space<vmem>>, %arg11: memref<1x32xf32, #tpu.memory_space<vmem>>, %arg12: memref<8x8xf32, #tpu.memory_space<vmem>>) attributes {dimension_semantics = [#tpu.dimension_semantics<parallel>, #tpu.dimension_semantics<arbitrary>], iteration_bounds = array<i64: 2, 1>, scalar_prefetch = 0 : i64, scratch_operands = 3 : i64, tpu.core_type = #tpu.core_type<tc>, window_params = [{transform_indices = @transform_0, window_bounds = array<i64: 1, 8, 32>}, {pipeline_mode = #tpu.pipeline_mode<synchronous>, transform_indices = @transform_1, window_bounds = array<i64: 32, 128>}, {pipeline_mode = #tpu.pipeline_mode<synchronous>, transform_indices = @transform_2, window_bounds = array<i64: 1, 128>}, {pipeline_mode = #tpu.pipeline_mode<synchronous>, transform_indices = @transform_3, window_bounds = array<i64: 32, 64>}, {pipeline_mode = #tpu.pipeline_mode<synchronous>, transform_indices = @transform_4, window_bounds = array<i64: 1, 64>}, {pipeline_mode = #tpu.pipeline_mode<synchronous>, transform_indices = @transform_5, window_bounds = array<i64: 32, 32>}, {pipeline_mode = #tpu.pipeline_mode<synchronous>, transform_indices = @transform_6, window_bounds = array<i64: 32, 32>}, {transform_indices = @transform_7, window_bounds = array<i64: 1, 8, 32>}]} {
    %c0 = arith.constant 0 : index
    %c0_0 = arith.constant 0 : index
    %c0_1 = arith.constant 0 : index
    %0 = vector.load %arg2[%c0, %c0_0, %c0_1] : memref<1x8x32xf32, #tpu.memory_space<vmem>>, vector<1x8x32xf32>
    %1 = vector.shape_cast %0 : vector<1x8x32xf32> to vector<8x32xf32>
    %c0_i32 = arith.constant 0 : i32
    %2 = arith.cmpi eq, %arg1, %c0_i32 : i32
    %3 = arith.extui %2 : i1 to i32
    %c0_i32_2 = arith.constant 0 : i32
    %4 = arith.cmpi ne, %3, %c0_i32_2 : i32
    scf.if %4 {
      %cst_36 = arith.constant 0.000000e+00 : f32
      %78 = vector.broadcast %cst_36 : f32 to vector<1x32xf32>
      %c0_37 = arith.constant 0 : index
      %c0_38 = arith.constant 0 : index
      %79 = vector.load %arg10[%c0_37, %c0_38] : memref<1x32xf32, #tpu.memory_space<vmem>>, vector<1x32xf32>
      tpu.vector_store %arg10[%c0_37, %c0_38], %78 {strides = array<i32>} : memref<1x32xf32, #tpu.memory_space<vmem>>, vector<1x32xf32>,
      %cst_39 = arith.constant 0.000000e+00 : f32
      %80 = vector.broadcast %cst_39 : f32 to vector<1x32xf32>
      %c0_40 = arith.constant 0 : index
      %c0_41 = arith.constant 0 : index
      %81 = vector.load %arg11[%c0_40, %c0_41] : memref<1x32xf32, #tpu.memory_space<vmem>>, vector<1x32xf32>
      tpu.vector_store %arg11[%c0_40, %c0_41], %80 {strides = array<i32>} : memref<1x32xf32, #tpu.memory_space<vmem>>, vector<1x32xf32>,
      %82 = tpu.iota {dimensions = array<i32: 0>} : vector<8x8xi32>
      %83 = tpu.iota {dimensions = array<i32: 1>} : vector<8x8xi32>
      %84 = arith.cmpi sge, %82, %83 : vector<8x8xi32>
      %cst_42 = arith.constant 1.000000e+00 : f32
      %cst_43 = arith.constant 0.000000e+00 : f32
      %85 = vector.broadcast %cst_42 : f32 to vector<8x8xf32>
      %86 = vector.broadcast %cst_43 : f32 to vector<8x8xf32>
      %87 = arith.select %84, %85, %86 : vector<8x8xi1>, vector<8x8xf32>
      %c0_44 = arith.constant 0 : index
      %c0_45 = arith.constant 0 : index
      %88 = vector.load %arg12[%c0_44, %c0_45] : memref<8x8xf32, #tpu.memory_space<vmem>>, vector<8x8xf32>
      tpu.vector_store %arg12[%c0_44, %c0_45], %87 {strides = array<i32>} : memref<8x8xf32, #tpu.memory_space<vmem>>, vector<8x8xf32>,
    } else {
    }
    %c0_3 = arith.constant 0 : index
    %c0_4 = arith.constant 0 : index
    %5 = vector.load %arg3[%c0_3, %c0_4] : memref<32x128xf32, #tpu.memory_space<vmem>>, vector<32x128xf32>
    %cst = arith.constant dense<0.000000e+00> : vector<8x128xf32>
    %6 = tpu.matmul %1, %5, %cst {dimension_numbers = #tpu.dot_dimension_numbers<[1], [0], [0], [1], [0, 0, 1, 1], [], []>} : vector<8x32xf32>, vector<32x128xf32>, vector<8x128xf32> -> vector<8x128xf32>
    %c0_5 = arith.constant 0 : index
    %c0_6 = arith.constant 0 : index
    %7 = vector.load %arg4[%c0_5, %c0_6] : memref<1x128xf32, #tpu.memory_space<vmem>>, vector<1x128xf32>
    %8 = vector.broadcast %7 : vector<1x128xf32> to vector<8x128xf32>
    %9 = arith.addf %6, %8 : vector<8x128xf32>
    %10 = vector.extract_strided_slice %9 {offsets = [0, 0], sizes = [8, 32], strides = [1, 1]} : vector<8x128xf32> to vector<8x32xf32>
    %11 = vector.extract_strided_slice %9 {offsets = [0, 32], sizes = [8, 32], strides = [1, 1]} : vector<8x128xf32> to vector<8x32xf32>
    %12 = vector.extract_strided_slice %9 {offsets = [0, 64], sizes = [8, 32], strides = [1, 1]} : vector<8x128xf32> to vector<8x32xf32>
    %13 = vector.extract_strided_slice %9 {offsets = [0, 96], sizes = [8, 32], strides = [1, 1]} : vector<8x128xf32> to vector<8x32xf32>
    %14 = arith.mulf %10, %10 : vector<8x32xf32>
    %15 = arith.mulf %12, %12 : vector<8x32xf32>
    %16 = arith.addf %14, %15 : vector<8x32xf32>
    %cst_7 = arith.constant 1.000000e-16 : f32
    %17 = vector.broadcast %cst_7 : f32 to vector<8x32xf32>
    %18 = arith.addf %16, %17 : vector<8x32xf32>
    %19 = math.rsqrt %18 : vector<8x32xf32>
    %20 = arith.mulf %10, %19 : vector<8x32xf32>
    %21 = arith.mulf %12, %19 : vector<8x32xf32>
    %22 = arith.mulf %11, %11 : vector<8x32xf32>
    %23 = arith.mulf %13, %13 : vector<8x32xf32>
    %24 = arith.addf %22, %23 : vector<8x32xf32>
    %cst_8 = arith.constant 1.000000e-16 : f32
    %25 = vector.broadcast %cst_8 : f32 to vector<8x32xf32>
    %26 = arith.addf %24, %25 : vector<8x32xf32>
    %27 = math.rsqrt %26 : vector<8x32xf32>
    %28 = arith.mulf %11, %27 : vector<8x32xf32>
    %29 = arith.mulf %13, %27 : vector<8x32xf32>
    %30 = arith.mulf %20, %28 : vector<8x32xf32>
    %31 = arith.mulf %21, %29 : vector<8x32xf32>
    %32 = arith.subf %30, %31 : vector<8x32xf32>
    %33 = arith.mulf %20, %29 : vector<8x32xf32>
    %34 = arith.mulf %21, %28 : vector<8x32xf32>
    %35 = arith.addf %33, %34 : vector<8x32xf32>
    %c0_9 = arith.constant 0 : index
    %c0_10 = arith.constant 0 : index
    %36 = vector.load %arg12[%c0_9, %c0_10] : memref<8x8xf32, #tpu.memory_space<vmem>>, vector<8x8xf32>
    %cst_11 = arith.constant dense<0.000000e+00> : vector<8x32xf32>
    %37 = tpu.matmul %36, %32, %cst_11 {dimension_numbers = #tpu.dot_dimension_numbers<[1], [0], [0], [1], [0, 0, 1, 1], [], []>} : vector<8x8xf32>, vector<8x32xf32>, vector<8x32xf32> -> vector<8x32xf32>
    %c0_12 = arith.constant 0 : index
    %c0_13 = arith.constant 0 : index
    %38 = vector.load %arg10[%c0_12, %c0_13] : memref<1x32xf32, #tpu.memory_space<vmem>>, vector<1x32xf32>
    %39 = vector.broadcast %38 : vector<1x32xf32> to vector<8x32xf32>
    %40 = arith.addf %37, %39 : vector<8x32xf32>
    %cst_14 = arith.constant dense<0.000000e+00> : vector<8x32xf32>
    %41 = tpu.matmul %36, %35, %cst_14 {dimension_numbers = #tpu.dot_dimension_numbers<[1], [0], [0], [1], [0, 0, 1, 1], [], []>} : vector<8x8xf32>, vector<8x32xf32>, vector<8x32xf32> -> vector<8x32xf32>
    %c0_15 = arith.constant 0 : index
    %c0_16 = arith.constant 0 : index
    %42 = vector.load %arg11[%c0_15, %c0_16] : memref<1x32xf32, #tpu.memory_space<vmem>>, vector<1x32xf32>
    %43 = vector.broadcast %42 : vector<1x32xf32> to vector<8x32xf32>
    %44 = arith.addf %41, %43 : vector<8x32xf32>
    %45 = vector.extract_strided_slice %40 {offsets = [7, 0], sizes = [1, 32], strides = [1, 1]} : vector<8x32xf32> to vector<1x32xf32>
    %c0_17 = arith.constant 0 : index
    %c0_18 = arith.constant 0 : index
    %46 = vector.load %arg10[%c0_17, %c0_18] : memref<1x32xf32, #tpu.memory_space<vmem>>, vector<1x32xf32>
    tpu.vector_store %arg10[%c0_17, %c0_18], %45 {strides = array<i32>} : memref<1x32xf32, #tpu.memory_space<vmem>>, vector<1x32xf32>,
    %47 = vector.extract_strided_slice %44 {offsets = [7, 0], sizes = [1, 32], strides = [1, 1]} : vector<8x32xf32> to vector<1x32xf32>
    %c0_19 = arith.constant 0 : index
    %c0_20 = arith.constant 0 : index
    %48 = vector.load %arg11[%c0_19, %c0_20] : memref<1x32xf32, #tpu.memory_space<vmem>>, vector<1x32xf32>
    tpu.vector_store %arg11[%c0_19, %c0_20], %47 {strides = array<i32>} : memref<1x32xf32, #tpu.memory_space<vmem>>, vector<1x32xf32>,
    %c0_21 = arith.constant 0 : index
    %c0_22 = arith.constant 0 : index
    %49 = vector.load %arg5[%c0_21, %c0_22] : memref<32x64xf32, #tpu.memory_space<vmem>>, vector<32x64xf32>
    %cst_23 = arith.constant dense<0.000000e+00> : vector<8x64xf32>
    %50 = tpu.matmul %1, %49, %cst_23 {dimension_numbers = #tpu.dot_dimension_numbers<[1], [0], [0], [1], [0, 0, 1, 1], [], []>} : vector<8x32xf32>, vector<32x64xf32>, vector<8x64xf32> -> vector<8x64xf32>
    %c0_24 = arith.constant 0 : index
    %c0_25 = arith.constant 0 : index
    %51 = vector.load %arg6[%c0_24, %c0_25] : memref<1x64xf32, #tpu.memory_space<vmem>>, vector<1x64xf32>
    %52 = vector.broadcast %51 : vector<1x64xf32> to vector<8x64xf32>
    %53 = arith.addf %50, %52 : vector<8x64xf32>
    %54 = vector.extract_strided_slice %53 {offsets = [0, 0], sizes = [8, 32], strides = [1, 1]} : vector<8x64xf32> to vector<8x32xf32>
    %55 = vector.extract_strided_slice %53 {offsets = [0, 32], sizes = [8, 32], strides = [1, 1]} : vector<8x64xf32> to vector<8x32xf32>
    %56 = arith.mulf %54, %54 : vector<8x32xf32>
    %57 = arith.mulf %55, %55 : vector<8x32xf32>
    %58 = arith.addf %56, %57 : vector<8x32xf32>
    %cst_26 = arith.constant 1.000000e-16 : f32
    %59 = vector.broadcast %cst_26 : f32 to vector<8x32xf32>
    %60 = arith.addf %58, %59 : vector<8x32xf32>
    %61 = math.rsqrt %60 : vector<8x32xf32>
    %62 = arith.mulf %54, %61 : vector<8x32xf32>
    %63 = arith.mulf %55, %61 : vector<8x32xf32>
    %64 = arith.mulf %40, %62 : vector<8x32xf32>
    %65 = arith.mulf %44, %63 : vector<8x32xf32>
    %66 = arith.addf %64, %65 : vector<8x32xf32>
    %67 = arith.mulf %44, %62 : vector<8x32xf32>
    %68 = arith.mulf %40, %63 : vector<8x32xf32>
    %69 = arith.subf %67, %68 : vector<8x32xf32>
    %c0_27 = arith.constant 0 : index
    %c0_28 = arith.constant 0 : index
    %70 = vector.load %arg7[%c0_27, %c0_28] : memref<32x32xf32, #tpu.memory_space<vmem>>, vector<32x32xf32>
    %cst_29 = arith.constant dense<0.000000e+00> : vector<8x32xf32>
    %71 = tpu.matmul %66, %70, %cst_29 {dimension_numbers = #tpu.dot_dimension_numbers<[1], [0], [0], [1], [0, 0, 1, 1], [], []>} : vector<8x32xf32>, vector<32x32xf32>, vector<8x32xf32> -> vector<8x32xf32>
    %c0_30 = arith.constant 0 : index
    %c0_31 = arith.constant 0 : index
    %72 = vector.load %arg8[%c0_30, %c0_31] : memref<32x32xf32, #tpu.memory_space<vmem>>, vector<32x32xf32>
    %cst_32 = arith.constant dense<0.000000e+00> : vector<8x32xf32>
    %73 = tpu.matmul %69, %72, %cst_32 {dimension_numbers = #tpu.dot_dimension_numbers<[1], [0], [0], [1], [0, 0, 1, 1], [], []>} : vector<8x32xf32>, vector<32x32xf32>, vector<8x32xf32> -> vector<8x32xf32>
    %74 = arith.addf %71, %73 : vector<8x32xf32>
    %c0_33 = arith.constant 0 : index
    %c0_34 = arith.constant 0 : index
    %c0_35 = arith.constant 0 : index
    %75 = vector.load %arg9[%c0_33, %c0_34, %c0_35] : memref<1x8x32xf32, #tpu.memory_space<vmem>>, vector<1x8x32xf32>
    %76 = vector.shape_cast %75 : vector<1x8x32xf32> to vector<8x32xf32>
    %77 = vector.shape_cast %74 : vector<8x32xf32> to vector<1x8x32xf32>
    tpu.vector_store %arg9[%c0_33, %c0_34, %c0_35], %77 {strides = array<i32>} : memref<1x8x32xf32, #tpu.memory_space<vmem>>, vector<1x8x32xf32>,
    return
  }
  func.func @transform_0(%arg0: i32, %arg1: i32) -> (i32, i32, i32) {
    %c0_i32 = arith.constant 0 : i32
    %c0_i32_0 = arith.constant 0 : i32
    return %arg0, %arg1, %c0_i32 : i32, i32, i32
  }
  func.func @transform_1(%arg0: i32, %arg1: i32) -> (i32, i32) {
    %c0_i32 = arith.constant 0 : i32
    %c0_i32_0 = arith.constant 0 : i32
    %c0_i32_1 = arith.constant 0 : i32
    return %c0_i32, %c0_i32_0 : i32, i32
  }
  func.func @transform_2(%arg0: i32, %arg1: i32) -> (i32, i32) {
    %c0_i32 = arith.constant 0 : i32
    %c0_i32_0 = arith.constant 0 : i32
    %c0_i32_1 = arith.constant 0 : i32
    return %c0_i32, %c0_i32_0 : i32, i32
  }
  func.func @transform_3(%arg0: i32, %arg1: i32) -> (i32, i32) {
    %c0_i32 = arith.constant 0 : i32
    %c0_i32_0 = arith.constant 0 : i32
    %c0_i32_1 = arith.constant 0 : i32
    return %c0_i32, %c0_i32_0 : i32, i32
  }
  func.func @transform_4(%arg0: i32, %arg1: i32) -> (i32, i32) {
    %c0_i32 = arith.constant 0 : i32
    %c0_i32_0 = arith.constant 0 : i32
    %c0_i32_1 = arith.constant 0 : i32
    return %c0_i32, %c0_i32_0 : i32, i32
  }
  func.func @transform_5(%arg0: i32, %arg1: i32) -> (i32, i32) {
    %c0_i32 = arith.constant 0 : i32
    %c0_i32_0 = arith.constant 0 : i32
    %c0_i32_1 = arith.constant 0 : i32
    return %c0_i32, %c0_i32_0 : i32, i32
  }
  func.func @transform_6(%arg0: i32, %arg1: i32) -> (i32, i32) {
    %c0_i32 = arith.constant 0 : i32
    %c0_i32_0 = arith.constant 0 : i32
    %c0_i32_1 = arith.constant 0 : i32
    return %c0_i32, %c0_i32_0 : i32, i32
  }
  func.func @transform_7(%arg0: i32, %arg1: i32) -> (i32, i32, i32) {
    %c0_i32 = arith.constant 0 : i32
    %c0_i32_0 = arith.constant 0 : i32
    return %arg0, %arg1, %c0_i32 : i32, i32, i32
  }
}

</mosaic_0001>

<bundles_post_ra>
// kernel: tpu_custom_call.1
= control target key start
LH: loop header
LB: loop body
LE: loop exit
PB: predicated region body
PF: predicated region fallthrough
CT: control target
= control target key end

     0   :  { %s1965_s0 = inlined_call_operand.hbm [shape: f32[2,8,32], index: 0, kind: input, shape index: {}]   ;;  %s1966_s1 = inlined_call_operand.hbm [shape: f32[32,128], index: 1, kind: input, shape index: {}]   ;;  %s1967_s2 = inlined_call_operand.vmem [shape: f32[1,128], index: 2, kind: input, shape index: {}]   ;;  %s1968_s3 = inlined_call_operand.hbm [shape: f32[32,64], index: 3, kind: input, shape index: {}]   ;;  %s1969_s4 = inlined_call_operand.vmem [shape: f32[1,64], index: 4, kind: input, shape index: {}]   ;;  %s1970_s5 = inlined_call_operand.hbm [shape: f32[32,32], index: 5, kind: input, shape index: {}]   ;;  %s1971_s6 = inlined_call_operand.hbm [shape: f32[32,32], index: 6, kind: input, shape index: {}]   ;;  %s1972_s7 = inlined_call_operand.hbm [shape: f32[2,8,32], index: 7, kind: output, shape index: {}]  }
   0x1   :  { %1979 = sst [smem:[#allocation19_spill]] %s1966_s1 }
   0x2   :  { %1980 = sst [smem:[#allocation20_spill]] %s1972_s7 }
   0x3   :  { %12 = vsyncpa [#allocation6], 0 }
   0x4   :  { %14 = vsyncpa [#allocation6 + $0x1], 0 }
   0x5   :  { %15 = vsyncpa [#allocation9], 0 }
   0x6   :  { %16 = vsyncpa [#allocation12], 0 }
   0x7   :  { %17 = vsyncpa [#allocation7], 0 }
   0x8   :  { %19 = vsyncpa [#allocation7 + $0x1], 0  ;;  %s1604_s24 = smov 0   ;;  %s1606_s25 = smov 0  }
   0x9   :  { %s1608_s26 = smov 0   ;;  %s1610_s27 = smov 0  }
   0xa   :  { %s1612_s28 = smov 0   ;;  %s1614_s29 = smov 0  }
   0xb LB: > { %s1973_s30 = sadd.s32 4294967295, %s1548_s29   ;;  %p1069_p0 = scmp.ge.s32.totalorder %s1548_s29, 1  ;;  %s1548_s29 = sphi %s1614_s29, %s25_s29   ;;  %s1544_s28 = sphi %s1612_s28, %s2003_s28   ;;  %s1540_s27 = sphi %s1610_s27, %s2002_s27   ;;  %s1536_s26 = sphi %s1608_s26, %s2001_s26   ;;  %s1532_s25 = sphi %s1606_s25, %s2000_s25   ;;  %s1528_s24 = sphi %s1604_s24, %s1999_s24  }
   0xc   : > { %p1638_p1 = scmp.eq.s32.totalorder %s1973_s30, 0  ;;  %p224_p2 = scmp.lt.s32.totalorder %s1548_s29, 3 }
   0xd   : > { %s1550_s10 = smov [#allocation8]   ;;  %s1551_s13 = smov [#allocation11]  }
   0xe   : > { %s1981_s8 = scalar_select %p1638_p1, 1, 0 }
   0xf   : > { %p1643_p3 = pnand %p1069_p0, %p224_p2  ;;  %s236_s11 = sshll.u32 %s1550_s10, 4  ;;  %s1647_s11 = int_to_ptr.vmem [resolvable:$true] %s236_s11 }
  0x10   : > { %s268_s14 = sshll.u32 %s1551_s13, 4  ;;  %s1552_s15 = smov [#allocation10]   ;;  %s1658_s14 = int_to_ptr.vmem [resolvable:$true] %s268_s14 }
  0x11   : > { %s1982_s9 = scalar_select %p1643_p3, 1, 0 }
  0x12   : > { %p1221_p4 = pneg %p1643_p3  ;;  %s1660_s16 = sshll.u32 %s1552_s15, 4  ;;  %s253_s16 = int_to_ptr.vmem [resolvable:$true] %s1660_s16 }
  0x13   : > { %s1984_s1 = sld [smem:[#allocation19_spill]] }
  0x14   : > { %p1654_p6 = pnand %p1221_p4, %p1638_p1 }
  0x16   : > { %p1670_p8 = pneg %p1654_p6 }
  0x19   : > { %s1316_s19 = scalar_lea.hbm %s1984_s1, 512 }
  0x1a   : > { %p1317_p7 = scmp.ne.s32.totalorder %s1984_s1, %s1316_s19  ;;  %p1323_p11 = scmp.lt.u32.totalorder %s1316_s19, %s1984_s1 }
  0x1c   : > { %p1319_p9 = pnand %p1670_p8, %p1317_p7 }
  0x1e   : > { %p1320_p10 = pneg %p1319_p9 }
  0x20   : > { %p1325_p12 = pnand %p1323_p11, %p1320_p10 }
  0x22   : > { %1328 = shalt.err (!%p1325_p12)
}
  0x23   : > { %s1329_s13 = scalar_lea.vmem %s1647_s11, 512  ;;  %p1337_p4 = scmp.lt.s32.totalorder %s1647_s11, %s1647_s11 }
  0x24   : > { %p1330_p13 = scmp.ne.s32.totalorder %s1647_s11, %s1329_s13  ;;  %p1338_p5 = scmp.lt.s32.totalorder %s1329_s13, %s1329_s13 }
  0x26   : > { %p1332_p0 = pnand %p1330_p13, %p1670_p8  ;;  %p1339_p7 = por %p1338_p5, %p1337_p4 }
  0x28   : > { %p1333_p2 = pneg %p1332_p0 }
  0x2a   : > { %p1340_p9 = pnand %p1339_p7, %p1333_p2 }
  0x2c   : > { %1343 = shalt.err (!%p1340_p9)
}
  0x2d   : > { %s1553_s15 = smov 128   ;;  %s1554_s17 = smov 8  }
  0x2e   : > { %1224 = dma.hbm_to_vmem [thread:$0]  (!%p1654_p6), %s1984_s1, 512, %s1647_s11, [#allocation9], %s1553_s15, %s1553_s15, %s1554_s17  }
  0x2f   : > { %s1344_s23 = scalar_lea.hbm %s1970_s5, 512 }
  0x30   : > { %p1345_p5 = scmp.ne.s32.totalorder %s1970_s5, %s1344_s23  ;;  %p1351_p12 = scmp.lt.u32.totalorder %s1344_s23, %s1970_s5 }
  0x32   : > { %p1347_p10 = pnand %p1345_p5, %p1670_p8 }
  0x34   : > { %p1348_p11 = pneg %p1347_p10 }
  0x36   : > { %p1353_p13 = pnand %p1351_p12, %p1348_p11 }
  0x38   : > { %1356 = shalt.err (!%p1353_p13)
}
  0x39   : > { %s1357_s11 = scalar_lea.vmem %s1658_s14, 512  ;;  %p1365_p7 = scmp.lt.s32.totalorder %s1658_s14, %s1658_s14 }
  0x3a   : > { %p1358_p0 = scmp.ne.s32.totalorder %s1658_s14, %s1357_s11  ;;  %p1366_p9 = scmp.lt.s32.totalorder %s1357_s11, %s1357_s11 }
  0x3c   : > { %p1360_p2 = pnand %p1358_p0, %p1670_p8  ;;  %p1367_p5 = por %p1366_p9, %p1365_p7 }
  0x3e   : > { %p1361_p4 = pneg %p1360_p2 }
  0x40   : > { %p1368_p10 = pnand %p1367_p5, %p1361_p4 }
  0x42   : > { %1371 = shalt.err (!%p1368_p10)
}
  0x43   : > { %1230 = dma.hbm_to_vmem [thread:$0]  (!%p1654_p6), %s1970_s5, 512, %s1658_s14, [#allocation12], %s1553_s15, %s1553_s15, %s1554_s17  }
  0x44   : > { %s1372_s20 = scalar_lea.hbm %s1968_s3, 512 }
  0x45   : > { %p1373_p11 = scmp.ne.s32.totalorder %s1968_s3, %s1372_s20  ;;  %p1379_p0 = scmp.lt.u32.totalorder %s1372_s20, %s1968_s3 }
  0x47   : > { %p1375_p12 = pnand %p1373_p11, %p1670_p8 }
  0x49   : > { %p1376_p13 = pneg %p1375_p12 }
  0x4b   : > { %p1381_p2 = pnand %p1379_p0, %p1376_p13 }
  0x4d   : > { %1384 = shalt.err (!%p1381_p2)
}
  0x4e   : > { %s1385_s11 = scalar_lea.vmem %s253_s16, 512  ;;  %p1393_p5 = scmp.lt.s32.totalorder %s253_s16, %s253_s16 }
  0x4f   : > { %p1386_p4 = scmp.ne.s32.totalorder %s253_s16, %s1385_s11  ;;  %p1394_p10 = scmp.lt.s32.totalorder %s1385_s11, %s1385_s11 }
  0x51   : > { %p1388_p7 = pnand %p1386_p4, %p1670_p8  ;;  %p1395_p3 = por %p1394_p10, %p1393_p5 }
  0x53   : > { %p1389_p9 = pneg %p1388_p7 }
  0x55   : > { %p1396_p1 = pnand %p1395_p3, %p1389_p9 }
  0x57   : > { %1399 = shalt.err (!%p1396_p1)
}
  0x58   : > { %1227 = dma.hbm_to_vmem [thread:$0]  (!%p1654_p6), %s1968_s3, 512, %s253_s16, [#allocation9], %s1553_s15, %s1553_s15, %s1554_s17  }
  0x59   : > { %s1555_s30 = smov [#allocation13]   ;;  %s1400_s21 = scalar_lea.hbm %s1971_s6, 512 }
  0x5a   : > { %s281_s18 = sshll.u32 %s1555_s30, 4  ;;  %p1401_p1 = scmp.ne.s32.totalorder %s1971_s6, %s1400_s21  ;;  %s282_s18 = int_to_ptr.vmem [resolvable:$true] %s281_s18 }
  0x5b   : > { %p1407_p12 = scmp.lt.u32.totalorder %s1400_s21, %s1971_s6 }
  0x5c   : > { %p1403_p3 = pnand %p1401_p1, %p1670_p8 }
  0x5e   : > { %p1404_p11 = pneg %p1403_p3 }
  0x60   : > { %p1409_p13 = pnand %p1407_p12, %p1404_p11 }
  0x62   : > { %1412 = shalt.err (!%p1409_p13)
}
  0x63   : > { %s1413_s16 = scalar_lea.vmem %s282_s18, 512  ;;  %p1421_p7 = scmp.lt.s32.totalorder %s282_s18, %s282_s18 }
  0x64   : > { %p1414_p0 = scmp.ne.s32.totalorder %s282_s18, %s1413_s16  ;;  %p1422_p9 = scmp.lt.s32.totalorder %s1413_s16, %s1413_s16 }
  0x66   : > { %p1416_p2 = pnand %p1414_p0, %p1670_p8  ;;  %p1423_p5 = por %p1422_p9, %p1421_p7 }
  0x68   : > { %p1417_p4 = pneg %p1416_p2 }
  0x6a   : > { %p1424_p10 = pnand %p1423_p5, %p1417_p4 }
  0x6c   : > { %1427 = shalt.err (!%p1424_p10)
}
  0x6d   : > { %1233 = dma.hbm_to_vmem [thread:$0]  (!%p1654_p6), %s1971_s6, 512, %s282_s18, [#allocation12], %s1553_s15, %s1553_s15, %s1554_s17  }
  0x6e   : > { %s1068_s12 = sadd.s32 4294967294, %s1548_s29   ;;  %s37_s22 = sadd.s32 1, %s1544_s28 }
  0x6f   : > { %p39_p8 = scmp.ge.s32.totalorder %s37_s22, 2  ;;  %s46_s30 = sadd.s32 1, %s1536_s26 }
  0x70   : > { %p53_p1 = scmp.ne.s32.totalorder %s1536_s26, %s1532_s25  ;;  %p54_p3 = scmp.eq.s32.totalorder %s1548_s29, 0 }
  0x71   : > { %s2005_s22 = smov (%p39_p8, %s37_s22), 0  ;;  %p59_p12 = scmp.ne.s32.totalorder %s1532_s25, %s1528_s24 }
  0x72   : > { %p1771_p11 = por %p54_p3, %p53_p1  ;;  %s41_s15 = ssub.s32 %s1544_s28, %s2005_s22 }
  0x73   : > { %s1987_s17 = sadd.s32 4294967295, %s1548_s29   ;;  %p44_p13 = scmp.eq.s32.totalorder %s41_s15, 0 }
  0x74   : > { %p211_p6 = scmp.eq.s32.totalorder %s1987_s17, 1  ;;  %p1988_p0 = scmp.ne.s32.totalorder %s1981_s8, 0 }
  0x75   : > { %p217_p7 = scmp.eq.s32.totalorder %s1068_s12, 1  ;;  %p1246_p5 = scmp.lt.s32.totalorder %s1548_s29, 2 }
  0x76   : > { %p1783_p2 = por %p1988_p0, %p59_p12  ;;  %p1787_p4 = por %p211_p6, %p53_p1 }
  0x77   : > { %s1792_s21 = scalar_select %p44_p13, %s1536_s26, %s46_s30  }
  0x78   : > { %s1990_s20 = scalar_select %p1787_p4, 1, 0 }
  0x79   : > { %p1794_p9 = por %p217_p7, %p59_p12  ;;  %s295_s10 = sand.u32 1, %s1536_s26  }
  0x7a   : > { %s1076_s13 = sshll.u32 %s1544_s28, 7  ;;  %s1075_s11 = sshll.u32 %s295_s10, 3 }
  0x7b   : > { %s1991_s23 = scalar_select %p1794_p9, 1, 0 }
  0x7c   : > { %s1804_s7 = scalar_lea.hbm %s1965_s0, %s1076_s13  ;;  %s299_s12 = scalar_lea.vmem [#allocation5], %s1075_s11 }
  0x7d   : > { %s307_s30 = sshll.u32 %s299_s12, 4  ;;  %p1808_p10 = pnand %p1246_p5, %p1771_p11  ;;  %s1812_s30 = int_to_ptr.vmem [resolvable:$true] %s307_s30 }
  0x7e   : > { %s296_s17 = scalar_lea.sflag [#allocation6], %s295_s10  ;;  %s1428_s1 = scalar_lea.hbm %s1804_s7, 128 }
  0x7f   : > { %p1429_p8 = scmp.ne.s32.totalorder %s1804_s7, %s1428_s1  ;;  %p1430_p1 = pneg %p1808_p10 }
  0x80   : > { %s1433_s19 = scalar_lea.hbm %s1965_s0, 256  ;;  %p1434_p11 = scmp.lt.u32.totalorder %s1804_s7, %s1965_s0 }
  0x81   : > { %p1431_p3 = pnand %p1430_p1, %p1429_p8  ;;  %p1435_p6 = scmp.lt.u32.totalorder %s1433_s19, %s1428_s1 }
  0x82   : > { %p1437_p0 = scmp.lt.u32.totalorder %s1428_s1, %s1804_s7 }
  0x83   : > { %p1432_p12 = pneg %p1431_p3  ;;  %p1436_p13 = por %p1435_p6, %p1434_p11 }
  0x85   : > { %p1438_p7 = por %p1437_p0, %p1436_p13 }
  0x87   : > { %p1439_p5 = pnand %p1438_p7, %p1432_p12 }
  0x89   : > { %1442 = shalt.err (!%p1439_p5)
}
  0x8a   : > { %s1443_s10 = scalar_lea.vmem %s1812_s30, 128  ;;  %s1556_s12 = smov [#allocation5]  }
  0x8b   : > { %p1444_p8 = scmp.ne.s32.totalorder %s1812_s30, %s1443_s10  ;;  %s1448_s13 = sshll.u32 %s1556_s12, 4  ;;  %s1449_s13 = int_to_ptr.vmem [resolvable:$false] %s1448_s13 }
  0x8c   : > { %s1450_s11 = scalar_lea.vmem %s1449_s13, 256  ;;  %p1451_p4 = scmp.lt.s32.totalorder %s1812_s30, %s1449_s13 }
  0x8d   : > { %p1446_p3 = pnand %p1444_p8, %p1430_p1  ;;  %p1452_p11 = scmp.lt.s32.totalorder %s1450_s11, %s1443_s10 }
  0x8f   : > { %p1447_p9 = pneg %p1446_p3  ;;  %p1453_p6 = por %p1452_p11, %p1451_p4 }
  0x91   : > { %p1454_p13 = pnand %p1453_p6, %p1447_p9 }
  0x93   : > { %1457 = shalt.err (!%p1454_p13)
}
  0x94   : > { %1237 = dma.hbm_to_vmem [thread:$0]  (!%p1808_p10), %s1804_s7, 128, %s1812_s30, %s296_s17  }
  0x95   : > { %p1993_p12 = scmp.ne.s32.totalorder %s1982_s9, 0 }
  0x96   : > { %s1842_s1 = sand.u32 (!%p1993_p12), 1, %s1532_s25  }
  0x97   : > { %316 = sbr.rel (%p1993_p12) target bundleno = 1576 (0x628), region = 48  ;;  %s1078_s19 = sshll.u32 (!%p1993_p12), %s1842_s1, 3 }
  0x98   : > { %s319_s16 = scalar_lea.sflag (!%p1993_p12), [#allocation6], %s1842_s1  ;;  %s322_s14 = scalar_lea.vmem (!%p1993_p12), [#allocation5], %s1078_s19 }
  0x9e   : > { %1511 = dma.done.wait (%p1783_p2), %s319_s16, 128  }
  0x9f   : > { %1513 = vsyncadd (%p1783_p2), %s319_s16, 4294967168  ;;  %p1994_p4 = scmp.ne.s32.totalorder %s1981_s8, 0 }
  0xa1   : > { %1515 = dma.done.wait (%p1994_p4), [#allocation9], 1024  }
  0xa2   : > { %1517 = vsyncadd (%p1994_p4), [#allocation9], 4294966272 }
  0xa3   : > { %1519 = dma.done.wait (%p1994_p4), [#allocation12], 1024  }
  0xa4   : > { %1521 = vsyncadd (%p1994_p4), [#allocation12], 4294966272  ;;  %v1557_v0 = vmov 0.0|0.0   ;;  %vm1558_vm0 = vmmov 0   ;;  %v1559_v1 = vmov 0.0   ;;  %v385_v2 = vld [vmem:[#allocation8] sm:$0xff]  ;;  %v377_v19 = vlaneseq }
  0xa5   : > { %1176 = vmatprep.subr.bf16.mxu0 %v1557_v0  ;;  %1130 = vmatprep.mubr.msk.f32.mxu0 %vm1558_vm0, %v1559_v1  ;;  %v386_v3 = vld [vmem:[#allocation8 + $0x8] sm:$0xff]  ;;  %v387_v4 = vld [vmem:[#allocation8 + $0x10] sm:$0xff]  ;;  %v388_v6 = vld [vmem:[#allocation8 + $0x18] sm:$0xff]  ;;  %vm396_vm1 = vcmask 261120   ;;  %s1560_s18 = smov 64   ;;  %s1561_s7 = smov 32  }
  0xa6   : > { %1138 = vmatprep.subr.mxu1 %v1559_v1  ;;  %1140 = vmatprep.mubr.msk.f32.mxu1 %vm1558_vm0, %v1559_v1  ;;  %v1177_v5 = vpack.c.bf16 %v386_v3, %v385_v2  ;;  %v1180_v7 = vpack.c.bf16 %v388_v6, %v387_v4  ;;  %v369_v8 = vld [vmem:[%s322_s14] sm:$0xff]  ;;  %v1084_v9 = vld [vmem:[%s1967_s2] ss:$0 sm:$0xff]  ;;  %v378_v20 = vshrl.u32 %v377_v19, 7  ;;  %v380_v21 = vand.u32 127, %v377_v19  ;;  %s1562_s30 = smov 96  }
  0xa7   : > { %vm383_vm3 = vcmask 64512   ;;  %vm374_vm4 = vcmask 253952   ;;  %v674_v28 = vld [vmem:[#allocation10] sm:$0xff]  ;;  %v675_v29 = vld [vmem:[#allocation10 + $0x8] sm:$0xff]  ;;  %v676_v36 = vld [vmem:[#allocation10 + $0x10] sm:$0xff]  ;;  %vm671_vm5 = vcmask 261127  }
  0xa8   : > { %1178 = vmatpush3.bf16.msra.mxu0 %v1177_v5  ;;  %vm381_vm2 = vcmp.ge.s32.totalorder %v378_v20, %v380_v21  ;;  %376 = vst.msk [vmem:[#allocation3] sm:$0x1] %vm374_vm4, %v1559_v1  ;;  %375 = vst.msk [vmem:[#allocation2] sm:$0x1] %vm374_vm4, %v1559_v1  ;;  %v1183_v34 = vpack.c.bf16 %v675_v29, %v674_v28  ;;  %v677_v37 = vld [vmem:[#allocation10 + $0x18] sm:$0xff]  ;;  %v783_v60 = vld [vmem:[#allocation13] sm:$0xff] }
  0xa9   : > { %1179 = vmatprep.subr.bf16.mxu0 %v1557_v0  ;;  %v382_v22 = vsel %vm381_vm2, 1.0, %v1559_v1  ;;  %v1186_v39 = vpack.c.bf16 %v677_v37, %v676_v36  ;;  %v1090_v48 = vld [vmem:[%s1969_s4] ss:$0 sm:$0xff]  ;;  %v784_v61 = vld [vmem:[#allocation13 + $0x8] sm:$0xff]  ;;  %v785_v4 = vld [vmem:[#allocation13 + $0x10] sm:$0xff]  ;;  %s1095_s10 = sshll.u32 %s1540_s27, 7 }
  0xaa   : > { %384 = vst.msk [vmem:[#allocation4] sm:$0xff] %vm383_vm3, %v382_v22  ;;  %v779_v62 = vld [vmem:[#allocation11] sm:$0xff]  ;;  %v1189_v63 = vpack.c.bf16 %v784_v61, %v783_v60  ;;  %v786_v5 = vld [vmem:[#allocation13 + $0x18] sm:$0xff]  ;;  %v781_v6 = vld [vmem:[#allocation11 + $0x10] sm:$0xff]  ;;  %s368_s12 = scalar_lea.vmem [#allocation14], %s1078_s19  ;;  %s1995_s14 = sld [smem:[#allocation20_spill]] }
  0xab   : > { %s949_s13 = sshll.u32 %s368_s12, 4  ;;  %s935_s27 = scalar_lea.sflag [#allocation7], %s1842_s1  ;;  %s1917_s13 = int_to_ptr.vmem [resolvable:$true] %s949_s13 }
  0xac   : > { %1181 = vmatpush3.bf16.msra.mxu0 %v1180_v7  ;;  %v1192_v7 = vpack.c.bf16 %v786_v5, %v785_v4  ;;  %s1458_s19 = scalar_lea.vmem %s1917_s13, 128  ;;  %p1996_p9 = scmp.ne.s32.totalorder %s1990_s20, 0 }
  0xad   : > { %1133 = vmatprep.subr.mxu0 %v1559_v1  ;;  %p1459_p2 = scmp.ne.s32.totalorder %s1917_s13, %s1458_s19  ;;  %s1563_s9 = smov [#allocation14]  }
  0xaf   : > { %1131 = vmatmul.mubr.msk.f32.vlgmr.msra.gmra.mrb[0].mxu0 %vm396_vm1, %v369_v8  ;;  %v1088_v44 = vld [vmem:[#allocation3] ss:$0 sm:$0xff]  ;;  %v1086_v53 = vld [vmem:[#allocation2] ss:$0 sm:$0xff]  ;;  %p1460_p10 = pnand %p1459_p2, %p1996_p9 }
  0xb0   : > { %1135 = vmatprep.mubr.msk.f32.mxu0 %vm1558_vm0, %v1559_v1  ;;  %s1915_s8 = scalar_lea.hbm %s1995_s14, %s1095_s10 }
  0xb1   : > { %v512_v33 = vld [vmem:[#allocation4] sm:$0xff]  ;;  %p1461_p1 = pneg %p1460_p10 }
 0x182   : > { %v466_v10 = vpop.f32.mrb[0].mxu0 }
 0x183   : > { %v467_v11 = vadd.f32 %v1084_v9, %v466_v10  ;;  %v1132_v12 = vpop.f32.mrb[1].mxu0 }
 0x185   : > { %v470_v13 = vmul.f32 %v467_v11, %v467_v11 }
 0x187   : > { %472 = vrot.lane.b32.xlu0 %v470_v13, %s1560_s18 }
 0x1f9   : > { %v473_v14 = vpop.permute.xlu0 %472 }
 0x1fa   : > { %v475_v15 = vadd.f32 %v473_v14, %v470_v13 }
 0x1fc   : > { %v476_v16 = vadd.f32 1e-16, %v475_v15 }
 0x1fe   : > { %1312 = vrsqrt.f32 %v476_v16 }
 0x208   : > { %v1313_v17 = vpop.eup %1312 }
 0x209   : > { %480 = vrot.lane.b32.xlu0 %v1313_v17, %s1560_s18  ;;  %v478_v18 = vmul.f32 %v1313_v17, %v467_v11 }
 0x20b   : > { %503 = vrot.lane.b32.xlu1 %v478_v18, %s1561_s7 }
 0x27b   : > { %v481_v23 = vpop.permute.xlu0 %480 }
 0x27c   : > { %v483_v24 = vmul.f32 %v481_v23, %v467_v11 }
 0x27d   : > { %v504_v25 = vpop.permute.xlu1 %503 }
 0x27e   : > { %v506_v26 = vmul.f32 %v504_v25, %v483_v24  ;;  %499 = vrot.lane.b32.xlu1 %v483_v24, %s1561_s7 }
 0x280   : > { %508 = vrot.lane.b32.xlu0 %v506_v26, %s1560_s18 }
 0x282   : > { %490 = vrot.lane.b32.xlu1 %v483_v24, %s1562_s30 }
 0x284   : > { %485 = vrot.lane.b32.xlu0 %v478_v18, %s1562_s30 }
 0x2f0   : > { %v500_v27 = vpop.permute.xlu1 %499 }
 0x2f1   : > { %v502_v30 = vmul.f32 %v500_v27, %v478_v18 }
 0x2f2   : > { %v509_v31 = vpop.permute.xlu0 %508 }
 0x2f3   : > { %v511_v32 = vadd.f32 %v509_v31, %v502_v30 }
 0x2f4   : > { %v491_v35 = vpop.permute.xlu1 %490 }
 0x2f5   : > { %v493_v38 = vmul.f32 %v491_v35, %v483_v24  ;;  %1139 = vmatpush3.msra.mxu1 %v511_v32 }
 0x2f6   : > { %1141 = vmatmul.mubr.msk.f32.vlgmr.msra.gmra.mrb[0].mxu1 %vm383_vm3, %v512_v33  ;;  %1182 = vmatprep.subr.bf16.mxu1 %v1557_v0  ;;  %v486_v40 = vpop.permute.xlu0 %485 }
 0x2f7   : > { %1184 = vmatpush3.bf16.msra.mxu1 %v1183_v34  ;;  %495 = vrot.lane.b32.xlu1 %v493_v38, %s1560_s18  ;;  %v488_v41 = vmul.f32 %v486_v40, %v478_v18  ;;  %s1462_s18 = sshll.u32 %s1563_s9, 4  ;;  %s1463_s18 = int_to_ptr.vmem [resolvable:$false] %s1462_s18 }
 0x2f8   : > { %1185 = vmatprep.subr.bf16.mxu1 %v1557_v0  ;;  %1151 = vmatprep.mubr.msk.f32.mxu1 %vm1558_vm0, %v1559_v1  ;;  %p1465_p0 = scmp.lt.s32.totalorder %s1917_s13, %s1463_s18 }
 0x2fb   : > { %1187 = vmatpush3.bf16.msra.mxu1 %v1186_v39 }
 0x2fc   : > { %1188 = vmatprep.subr.bf16.mxu1 %v1557_v0 }
 0x2fe   : > { %1152 = vmatmul.mubr.msk.f32.vlgmr.msra.gmra.mrb[2].mxu1 %vm396_vm1, %v369_v8  ;;  %v782_v8 = vld [vmem:[#allocation11 + $0x18] sm:$0xff] }
 0x2ff   : > { %1162 = vmatprep.mubr.msk.f32.mxu1 %vm1558_vm0, %v1559_v1  ;;  %1190 = vmatpush3.bf16.msra.mxu1 %v1189_v63  ;;  %v1198_v9 = vpack.c.bf16 %v782_v8, %v781_v6 }
 0x300   : > { %1191 = vmatprep.subr.bf16.mxu1 %v1557_v0 }
 0x303   : > { %1193 = vmatpush3.bf16.msra.mxu1 %v1192_v7 }
 0x369   : > { %v496_v42 = vpop.permute.xlu1 %495 }
 0x36a   : > { %v498_v43 = vsub.f32 %v488_v41, %v496_v42 }
 0x36c   : > { %1134 = vmatpush3.msra.mxu0 %v498_v43 }
 0x36d   : > { %1136 = vmatmul.mubr.msk.f32.vlgmr.msra.gmra.mrb[2].mxu0 %vm383_vm3, %v512_v33  ;;  %1194 = vmatprep.subr.bf16.mxu0 %v1557_v0 }
 0x36e   : > { %1173 = vmatprep.mubr.msk.f32.mxu0 %vm1558_vm0, %v1559_v1  ;;  %v780_v1 = vld [vmem:[#allocation11 + $0x8] sm:$0xff] }
 0x36f   : > { %v1195_v2 = vpack.c.bf16 %v780_v1, %v779_v62 }
 0x371   : > { %1196 = vmatpush3.bf16.msra.mxu0 %v1195_v2 }
 0x372   : > { %1197 = vmatprep.subr.bf16.mxu0 %v1557_v0 }
 0x375   : > { %1199 = vmatpush3.bf16.msra.mxu0 %v1198_v9 }
 0x3c9   : > { %v667_v45 = vpop.f32.mrb[0].mxu1 }
 0x3ca   : > { %v668_v46 = vadd.f32 %v1088_v44, %v667_v45  ;;  %v1142_v47 = vpop.f32.mrb[1].mxu1 }
 0x3cc   : > { %673 = vst.msk [vmem:[#allocation3 - $0x7] sm:$0x80] %vm671_vm5, %v668_v46 }
 0x3d1   : > { %v751_v49 = vpop.f32.mrb[2].mxu1 }
 0x3d2   : > { %v752_v50 = vadd.f32 %v1090_v48, %v751_v49  ;;  %v1153_v51 = vpop.f32.mrb[3].mxu1 }
 0x3d4   : > { %v755_v52 = vmul.f32 %v752_v50, %v752_v50 }
 0x3d6   : > { %757 = vrot.lane.b32.xlu0 %v755_v52, %s1562_s30 }
 0x440   : > { %v590_v54 = vpop.f32.mrb[2].mxu0 }
 0x441   : > { %v591_v55 = vadd.f32 %v1086_v53, %v590_v54  ;;  %v1137_v56 = vpop.f32.mrb[3].mxu0 }
 0x443   : > { %672 = vst.msk [vmem:[#allocation2 - $0x7] sm:$0x80] %vm671_vm5, %v591_v55 }
 0x448   : > { %v758_v57 = vpop.permute.xlu0 %757 }
 0x449   : > { %v760_v58 = vadd.f32 %v758_v57, %v755_v52 }
 0x44b   : > { %v761_v59 = vadd.f32 1e-16, %v760_v58 }
 0x44d   : > { %1314 = vrsqrt.f32 %v761_v59 }
 0x457   : > { %v1315_v3 = vpop.eup %1314 }
 0x458   : > { %765 = vrot.lane.b32.xlu1 %v1315_v3, %s1561_s7  ;;  %v763_v12 = vmul.f32 %v1315_v3, %v752_v50  ;;  %s1464_s7 = scalar_lea.vmem %s1463_s18, 256 }
 0x459   : > { %p1466_p7 = scmp.lt.s32.totalorder %s1464_s7, %s1458_s19 }
 0x45a   : > { %v776_v0 = vmul.f32 %v763_v12, %v668_v46  ;;  %v769_v14 = vmul.f32 %v763_v12, %v591_v55 }
 0x45b   : > { %p1467_p5 = por %p1466_p7, %p1465_p0 }
 0x45d   : > { %p1468_p8 = pnand %p1467_p5, %p1461_p1 }
 0x4ca   : > { %v766_v10 = vpop.permute.xlu1 %765 }
 0x4cb   : > { %v768_v11 = vmul.f32 %v766_v10, %v752_v50 }
 0x4cd   : > { %771 = vrot.lane.b32.xlu0 %v768_v11, %s1562_s30 }
 0x53f   : > { %v772_v13 = vpop.permute.xlu0 %771 }
 0x540   : > { %v774_v15 = vmul.f32 %v772_v13, %v668_v46  ;;  %v777_v16 = vmul.f32 %v772_v13, %v591_v55 }
 0x542   : > { %v775_v17 = vadd.f32 %v774_v15, %v769_v14  ;;  %v778_v18 = vsub.f32 %v776_v0, %v777_v16 }
 0x544   : > { %1163 = vmatmul.mubr.msk.f32.vlgmr.msra.gmra.mrb[4].mxu1 %vm396_vm1, %v778_v18  ;;  %1174 = vmatmul.mubr.msk.f32.vlgmr.msra.gmra.mrb[4].mxu0 %vm396_vm1, %v775_v17 }
 0x617   : > { %v856_v19 = vpop.f32.mrb[4].mxu1  ;;  %v929_v20 = vpop.f32.mrb[4].mxu0 }
 0x618   : > { %v930_v21 = vadd.f32 %v929_v20, %v856_v19  ;;  %v1164_v22 = vpop.f32.mrb[5].mxu1  ;;  %v1175_v23 = vpop.f32.mrb[5].mxu0 }
 0x61a   : > { %933 = vst.msk [vmem:[%s368_s12] sm:$0xff] %vm396_vm1, %v930_v21 }
 0x61b   : > { %1471 = shalt.err (!%p1468_p8)
}
 0x61c   : > { %s1472_s1 = scalar_lea.hbm %s1915_s8, 128  ;;  %s1476_s17 = scalar_lea.hbm %s1995_s14, 256 }
 0x61d   : > { %p1473_p3 = scmp.ne.s32.totalorder %s1915_s8, %s1472_s1  ;;  %p1477_p13 = scmp.lt.u32.totalorder %s1915_s8, %s1995_s14 }
 0x61e   : > { %p1478_p12 = scmp.lt.u32.totalorder %s1476_s17, %s1472_s1  ;;  %p1480_p2 = scmp.lt.u32.totalorder %s1472_s1, %s1915_s8 }
 0x61f   : > { %p1474_p11 = pnand %p1473_p3, %p1996_p9 }
 0x620   : > { %p1479_p4 = por %p1478_p12, %p1477_p13 }
 0x621   : > { %p1475_p6 = pneg %p1474_p11 }
 0x622   : > { %p1481_p10 = por %p1480_p2, %p1479_p4 }
 0x624   : > { %p1482_p1 = pnand %p1481_p10, %p1475_p6 }
 0x626   : > { %1485 = shalt.err (!%p1482_p1)
}
 0x627   : > { %1219 = dma.vmem_to_hbm [thread:$0]  (%p1996_p9), %s1917_s13, 128, %s1915_s8, %s935_s27  }
 0x628 PF: > { %s961_s11 = sand.u32 1, %s1528_s24   ;;  %p1997_p0 = scmp.ne.s32.totalorder %s1991_s23, 0 }
 0x629   : > { %p1998_p7 = scmp.ge.s32.totalorder %s1548_s29, 2  ;;  %s962_s16 = scalar_lea.sflag [#allocation7], %s961_s11 }
 0x62b   : > { %p1239_p5 = pnand %p1998_p7, %p1997_p0 }
 0x62d   : > { %1523 = dma.done.wait (!%p1239_p5), %s962_s16, 128  }
 0x62e   : > { %1525 = vsyncadd (!%p1239_p5), %s962_s16, 4294967168  ;;  %s25_s29 = sadd.s32 1, %s1548_s29   ;;  %s1999_s24 = smov %s1532_s25 }
 0x62f   : > { %p22_p8 = scmp.ge.s32.totalorder %s25_s29, 4   ;;  %s2000_s25 = smov %s1536_s26 }
 0x630   : > { %s2001_s26 = smov %s1792_s21  ;;  %s2002_s27 = smov %s1544_s28 }
 0x631   : > { %s2003_s28 = smov %s2005_s22  ;;  %24 = sbr.rel (!%p22_p8) target bundleno = 11 (0xb), region = 113 }
 0x638   :  { %967 = vsyncpa [#allocation6], 1 }
 0x639   :  { %969 = vsyncpa [#allocation6 + $0x1], 1 }
 0x63a   :  { %970 = vsyncpa [#allocation9], 1 }
 0x63b   :  { %971 = vsyncpa [#allocation12], 1 }
 0x63c   :  { %972 = vsyncpa [#allocation7], 1 }
 0x63d   :  { %974 = vsyncpa [#allocation7 + $0x1], 1 }

</bundles_post_ra>
